<compile_context>
chip_gen: v5e
topology: v5e:2x2
jax: 0.10.0
libtpu: 0.0.40
codegen_flags: <defaults>
</compile_context>

<pallas_src>
import jax
import jax.numpy as jnp
from jax.experimental import pallas as pl
from jax.experimental.pallas import tpu as pltpu


def _hbm_copy_kernel(x_hbm_ref, o_hbm_ref, sem):
    # Entire forward pass of SLATE (identity), expressed as one HBM->HBM DMA.
    cp = pltpu.make_async_copy(x_hbm_ref, o_hbm_ref, sem)
    cp.start()
    cp.wait()


def _pallas_identity_copy(x: jnp.ndarray) -> jnp.ndarray:
    """Materialize an exact copy of `x` via a direct HBM->HBM DMA kernel."""
    if x.size == 0:
        return x

    orig_shape = x.shape
    # Keep the DMA over a >=1-D ref; 0-d copies are a degenerate edge case.
    x_in = x.reshape((1,)) if x.ndim == 0 else x

    itemsize = jnp.dtype(x.dtype).itemsize
    y = pl.pallas_call(
        _hbm_copy_kernel,
        out_shape=jax.ShapeDtypeStruct(x_in.shape, x_in.dtype),
        in_specs=[pl.BlockSpec(memory_space=pl.ANY)],
        out_specs=pl.BlockSpec(memory_space=pl.ANY),
        scratch_shapes=[pltpu.SemaphoreType.DMA],
        cost_estimate=pl.CostEstimate(
            flops=0,
            transcendentals=0,
            bytes_accessed=2 * x_in.size * itemsize,
        ),
    )(x_in)

    return y.reshape(orig_shape)


def slate_forward(x: jnp.ndarray, *, materialize: bool = False) -> jnp.ndarray:
    """Identity forward pass of SLATE.

    Args:
        x: tensor of any shape/dtype supported on TPU (module uses NCHW).
        materialize: if False (default), return `x` itself — a pure metadata
            op with zero HBM traffic, matching `forward(self, x): return x`.
            If True, produce a fresh buffer through the Pallas HBM->HBM DMA
            copy kernel (minimal 2N bytes of HBM traffic, no padding, no VMEM).
    Returns:
        Tensor identical to `x` (same shape, dtype, values).
    """
    if not materialize:
        return x
    return _pallas_identity_copy(x)


if __name__ == "__main__":
    key = jax.random.PRNGKey(0)
    # Small NCHW input consistent with the module's image-style usage.
    x = jax.random.normal(key, (2, 4, 16, 16), dtype=jnp.float32)

    # Default path: pure identity, zero-copy metadata return.
    y_id = slate_forward(x)
    assert y_id.shape == x.shape and y_id.dtype == x.dtype

    # Materialized path: run the Pallas HBM->HBM DMA kernel once and block.
    y = jax.block_until_ready(slate_forward(x, materialize=True))
    assert y.shape == x.shape, (y.shape, x.shape)
    assert y.dtype == x.dtype, (y.dtype, x.dtype)
    assert bool(jnp.array_equal(y, x)), "identity forward mismatch"

    # Exercise a larger tensor (multi-MiB DMA) and a packed dtype once.
    x_big = jax.random.normal(key, (4, 64, 64, 64), dtype=jnp.float32)  # 4 MiB
    y_big = jax.block_until_ready(slate_forward(x_big, materialize=True))
    assert bool(jnp.array_equal(y_big, x_big)), "large-path identity mismatch"

    x_bf16 = jax.random.normal(key, (2, 4, 16, 16), dtype=jnp.bfloat16)
    y_bf16 = jax.block_until_ready(slate_forward(x_bf16, materialize=True))
    assert bool(jnp.array_equal(y_bf16, x_bf16)), "bf16 identity mismatch"

    print("KERNEL_OK")
</pallas_src>

<mosaic_0001>
module attributes {stable_mosaic.version = 11 : i64} {
  func.func @_hbm_copy_kernel(%arg0: memref<2x4x16x16xf32, #tpu.memory_space<any>>, %arg1: memref<2x4x16x16xf32, #tpu.memory_space<any>>, %arg2: memref<!tpu.dma_semaphore, #tpu.memory_space<semaphore_mem>>) attributes {dimension_semantics = [], scalar_prefetch = 0 : i64, scratch_operands = 1 : i64, tpu.core_type = #tpu.core_type<tc>} {
    tpu.enqueue_dma source(%arg0 : memref<2x4x16x16xf32, #tpu.memory_space<any>>) target(%arg1 : memref<2x4x16x16xf32, #tpu.memory_space<any>>) target_semaphore(%arg2 : memref<!tpu.dma_semaphore, #tpu.memory_space<semaphore_mem>>)
    tpu.wait_dma2 semaphore(%arg2 : memref<!tpu.dma_semaphore, #tpu.memory_space<semaphore_mem>>) src(%arg0 : memref<2x4x16x16xf32, #tpu.memory_space<any>>) dst(%arg1 : memref<2x4x16x16xf32, #tpu.memory_space<any>>)
    return
  }
}

</mosaic_0001>

<bundles_post_ra>
// kernel: tpu_custom_call.1
= control target key start
LH: loop header
LB: loop body
LE: loop exit
PB: predicated region body
PF: predicated region fallthrough
CT: control target
= control target key end

     0   :  { %s34_s12 = smov [#allocation2]   ;;  %s35_s13 = smov [#allocation3]   ;;  %s53_s0 = inlined_call_operand.hbm [shape: f32[2,4,16,16], index: 0, kind: input, shape index: {}]   ;;  %s54_s1 = inlined_call_operand.hbm [shape: f32[2,4,16,16], index: 1, kind: output, shape index: {}]  }
   0x1   :  { %s10_s8 = sshll.u32 %s53_s0, 4  ;;  %s12_s11 = sshll.u32 %s54_s1, 4  ;;  %s11_s8 = int_to_ptr.hbm [resolvable:$true] %s10_s8  ;;  %s13_s11 = int_to_ptr.hbm [resolvable:$true] %s12_s11 }
   0x2   :  { %s36_s14 = smov 0  }
   0x3   :  { %16 = dma.general %s11_s8, 2048, %s13_s11, %s34_s12, %s35_s13, [#allocation4], %s36_s14, 0  }
   0x4   :  { %32 = dma.done.wait [#allocation2], 2048 }
   0x5   :  { %33 = vsyncadd [#allocation2], 4294965248 }
   0x6   :  { %22 = vsyncmov [#allocation2] }
   0x9   :  { %s23_s15 = vpop.sfrf %22 }
   0xa   :  { %p28_p0 = scmp.ne.s32.totalorder %s23_s15, 0 }
   0xc   :  { %27 = shalt.err (%p28_p0)  }

</bundles_post_ra>
